<compile_context>
chip_gen: v7x
topology: tpu7x:2x2x1
jax: 0.10.0
libtpu: 0.0.40
codegen_flags: <defaults>
</compile_context>

<pallas_src>
import jax
import jax.numpy as jnp
from jax.experimental import pallas as pl
from jax.experimental.pallas import tpu as pltpu

_NUM_LAYERS = 6  # fused-branch linear + 3 main linears + 2 output linears


def quantile_mlp_kernel(x_ref, w_ref, b_ref, out_ref):
    # x_ref: [TB, P] bf16   w_ref: [6, P, P] bf16   b_ref: [8, P] f32
    # out_ref: [TB, P] bf16
    # Layer 0: fused block-diagonal branch linears (no preceding ReLU).
    x = jnp.dot(x_ref[...], w_ref[0],
                preferred_element_type=jnp.float32) + b_ref[0:1, :]
    # main_network: (ReLU, Linear) x3 then trailing ReLU; output_network:
    # (ReLU[dup, dropped], Linear, ReLU, Linear) -> ReLU before each of W1..W5.
    for i in range(1, _NUM_LAYERS):
        x = jnp.maximum(x, 0.0)                                   # f32 ReLU
        x = jnp.dot(x.astype(jnp.bfloat16), w_ref[i],             # bf16 MXU
                    preferred_element_type=jnp.float32) + b_ref[i:i + 1, :]
    out_ref[...] = x.astype(out_ref.dtype)


def _round_up(n, m):
    return ((n + m - 1) // m) * m


def make_params(key, history_size, feature_size, hidden_size,
                hidden_size_history, output_size):
    """Deterministic synthetic parameters (shapes match the nn.Module __init__)."""
    h0, h1, h2, h3, h4 = hidden_size
    concat_size = 2 * h0 + hidden_size_history

    def linear(k, fan_in, fan_out):
        kw, kb = jax.random.split(k)
        scale = 1.0 / jnp.sqrt(jnp.float32(fan_in))
        w = jax.random.uniform(kw, (fan_in, fan_out), jnp.float32, -scale, scale)
        b = jax.random.uniform(kb, (1, fan_out), jnp.float32, -scale, scale)
        return w, b

    keys = jax.random.split(key, 8)
    return [
        linear(keys[0], history_size, hidden_size_history),  # history_network
        linear(keys[1], feature_size, h0),                    # feature1_network
        linear(keys[2], feature_size, h0),                    # feature2_network
        linear(keys[3], concat_size, h1),                     # main Linear 1
        linear(keys[4], h1, h2),                              # main Linear 2
        linear(keys[5], h2, h3),                              # main Linear 3
        linear(keys[6], h3, h4),                              # output Linear 1
        linear(keys[7], h4, output_size),                     # output Linear 2
    ]


def pack_params(raw_params, history_size, feature_size, hidden_size,
                hidden_size_history, output_size):
    """Pack per-layer weights (bf16) and biases (f32) into zero-padded slabs."""
    (wh, bh), (wf1, bf1), (wf2, bf2), (wm1, bm1), (wm2, bm2), (wm3, bm3), \
        (wo1, bo1), (wo2, bo2) = raw_params
    h0, _, _, _, _ = hidden_size
    d_in = history_size + 2 * feature_size
    c = hidden_size_history + 2 * h0

    # Fuse the three branch linears into one block-diagonal weight so that the
    # kernel computes concat([history@wh, f1@wf1, f2@wf2]) with a single matmul.
    w0 = jnp.zeros((d_in, c), jnp.float32)
    w0 = w0.at[:history_size, :hidden_size_history].set(wh)
    w0 = w0.at[history_size:history_size + feature_size,
               hidden_size_history:hidden_size_history + h0].set(wf1)
    w0 = w0.at[history_size + feature_size:,
               hidden_size_history + h0:].set(wf2)
    b0 = jnp.concatenate([bh, bf1, bf2], axis=1)

    layers = [(w0, b0), (wm1, bm1), (wm2, bm2),
              (wm3, bm3), (wo1, bo1), (wo2, bo2)]

    p = max(max(w.shape[0], w.shape[1]) for w, _ in layers)
    p = _round_up(p, 128)  # lane-align every layer; zero padding keeps math exact

    def pad_w(w):
        out = jnp.zeros((p, p), jnp.float32)
        return out.at[:w.shape[0], :w.shape[1]].set(w).astype(jnp.bfloat16)

    def pad_b(b):
        out = jnp.zeros((p,), jnp.float32)
        return out.at[:b.shape[-1]].set(b.reshape(-1))

    w_slab = jnp.stack([pad_w(w) for w, _ in layers])   # [6, P, P] bf16
    b_slab = jnp.stack([pad_b(b) for _, b in layers])   # [6, P]    f32
    b_slab = jnp.pad(b_slab,
                     ((0, _round_up(_NUM_LAYERS, 8) - _NUM_LAYERS), (0, 0)))  # [8, P]
    return w_slab, b_slab


def quantile_mlp_forward(history, feature1, feature2, w_slab, b_slab,
                         output_size, *, batch_tile=4096, core_parallel=False):
    """Full forward pass in one Pallas call (batch-tiled for larger batches)."""
    B = history.shape[0]
    P = w_slab.shape[-1]

    # Build the concatenated, lane-padded input slab directly in bf16.
    x = jnp.concatenate([history, feature1, feature2], axis=1).astype(jnp.bfloat16)
    d_in = x.shape[1]
    x = jnp.pad(x, ((0, 0), (0, P - d_in)))

    # Batch tiling: 16-row aligned (bf16 sublane packing), zero-pad the batch.
    TB = min(batch_tile, _round_up(B, 16))
    Bp = _round_up(_round_up(B, 16), TB)
    if Bp != B:
        x = jnp.pad(x, ((0, Bp - B), (0, 0)))
    n_steps = Bp // TB
    grid = (n_steps,)

    # v7x: engage the second TensorCore when there are >=2 grid steps.
    if core_parallel and n_steps >= 2:
        dim_sem = (pltpu.CORE_PARALLEL,)
    else:
        dim_sem = ("parallel",)

    flops = 2 * Bp * P * P * _NUM_LAYERS
    bytes_accessed = (2 * x.size          # bf16 input slab
                      + 2 * w_slab.size   # bf16 weights (read once)
                      + 4 * b_slab.size   # f32 biases
                      + 2 * Bp * P)       # bf16 output slab

    out = pl.pallas_call(
        quantile_mlp_kernel,
        out_shape=jax.ShapeDtypeStruct((Bp, P), jnp.bfloat16),
        grid_spec=pl.GridSpec(
            grid=grid,
            in_specs=[
                pl.BlockSpec((TB, P), lambda i: (i, 0)),          # inputs: tiled on batch
                # Constant index_map => weights/biases stay resident in VMEM
                # across all grid steps (no per-step re-DMA).
                pl.BlockSpec(w_slab.shape, lambda i: (0, 0, 0)),
                pl.BlockSpec(b_slab.shape, lambda i: (0, 0)),
            ],
            out_specs=pl.BlockSpec((TB, P), lambda i: (i, 0)),
        ),
        compiler_params=pltpu.CompilerParams(
            dimension_semantics=dim_sem),
        cost_estimate=pl.CostEstimate(
            flops=flops, transcendentals=0, bytes_accessed=bytes_accessed),
    )(x, w_slab, b_slab)

    # Slice the real batch rows / output columns; return f32 to the caller.
    return out[:B, :output_size].astype(jnp.float32)


def reference_forward(history, feature1, feature2, raw_params):
    """Pure-JAX f32 reference mirroring the PyTorch module exactly."""
    (wh, bh), (wf1, bf1), (wf2, bf2), (wm1, bm1), (wm2, bm2), (wm3, bm3), \
        (wo1, bo1), (wo2, bo2) = raw_params
    h = history @ wh + bh
    a = feature1 @ wf1 + bf1
    b = feature2 @ wf2 + bf2
    x = jnp.concatenate([h, a, b], axis=1)
    x = jnp.maximum(x, 0.0)
    x = x @ wm1 + bm1
    x = jnp.maximum(x, 0.0)
    x = x @ wm2 + bm2
    x = jnp.maximum(x, 0.0)
    x = x @ wm3 + bm3
    x = jnp.maximum(x, 0.0)
    x = jnp.maximum(x, 0.0)   # leading ReLU of output_network (idempotent)
    x = x @ wo1 + bo1
    x = jnp.maximum(x, 0.0)
    return x @ wo2 + bo2


def reference_forward_bf16(history, feature1, feature2, raw_params):
    """Reference mirroring the kernel's bf16-mul / f32-accumulate arithmetic."""
    def lin(x, p):
        w, b = p
        return jnp.dot(x.astype(jnp.bfloat16), w.astype(jnp.bfloat16),
                       preferred_element_type=jnp.float32) + b

    (ph, pf1, pf2, pm1, pm2, pm3, po1, po2) = raw_params
    h = lin(history, ph)
    a = lin(feature1, pf1)
    b = lin(feature2, pf2)
    x = jnp.concatenate([h, a, b], axis=1)
    for p in (pm1, pm2, pm3, po1):
        x = jnp.maximum(x, 0.0)
        x = lin(x, p)
    x = jnp.maximum(x, 0.0)
    x = lin(x, po2)
    # Kernel stores its output in bf16; mirror that final rounding.
    return x.astype(jnp.bfloat16).astype(jnp.float32)


if __name__ == "__main__":
    # Small, module-consistent shapes.
    batch = 8
    history_size = 16
    feature_size = 8
    hidden_size = (32, 64, 64, 32, 32)
    hidden_size_history = 16
    output_size = 8
    quantile = 0.5  # only used by the training-time loss, not the forward pass

    key = jax.random.PRNGKey(0)
    k_hist, k_f1, k_f2, k_params = jax.random.split(key, 4)

    history = jax.random.normal(k_hist, (batch, history_size), jnp.float32)
    feature1 = jax.random.normal(k_f1, (batch, feature_size), jnp.float32)
    feature2 = jax.random.normal(k_f2, (batch, feature_size), jnp.float32)

    raw_params = make_params(k_params, history_size, feature_size, hidden_size,
                             hidden_size_history, output_size)
    w_slab, b_slab = pack_params(raw_params, history_size, feature_size,
                                 hidden_size, hidden_size_history, output_size)

    q = quantile_mlp_forward(history, feature1, feature2, w_slab, b_slab,
                             output_size)
    q = jax.block_until_ready(q)

    q_ref_bf16 = reference_forward_bf16(history, feature1, feature2, raw_params)
    q_ref_f32 = reference_forward(history, feature1, feature2, raw_params)

    assert q.shape == (batch, output_size)
    # Tight check against the bf16-mirrored reference (same arithmetic).
    assert jnp.allclose(q, q_ref_bf16, atol=1e-2, rtol=1e-2)
    # Loose sanity check against the exact f32 reference (bf16 quantization).
    assert jnp.allclose(q, q_ref_f32, atol=5e-2, rtol=5e-2)

    print("KERNEL_OK")
</pallas_src>

<mosaic_0001>
module attributes {stable_mosaic.version = 11 : i64} {
  func.func @quantile_mlp_kernel(%arg0: i32, %arg1: memref<16x128xbf16, #tpu.memory_space<vmem>>, %arg2: memref<6x128x128xbf16, #tpu.memory_space<vmem>>, %arg3: memref<8x128xf32, #tpu.memory_space<vmem>>, %arg4: memref<16x128xbf16, #tpu.memory_space<vmem>>) attributes {dimension_semantics = [#tpu.dimension_semantics<parallel>], iteration_bounds = array<i64: 1>, scalar_prefetch = 0 : i64, scratch_operands = 0 : i64, tpu.core_type = #tpu.core_type<tc>, window_params = [{transform_indices = @transform_0, window_bounds = array<i64: 16, 128>}, {pipeline_mode = #tpu.pipeline_mode<synchronous>, transform_indices = @transform_1, window_bounds = array<i64: 6, 128, 128>}, {pipeline_mode = #tpu.pipeline_mode<synchronous>, transform_indices = @transform_2, window_bounds = array<i64: 8, 128>}, {transform_indices = @transform_3, window_bounds = array<i64: 16, 128>}]} {
    %c0 = arith.constant 0 : index
    %c0_0 = arith.constant 0 : index
    %0 = vector.load %arg1[%c0, %c0_0] : memref<16x128xbf16, #tpu.memory_space<vmem>>, vector<16x128xbf16>
    %c0_1 = arith.constant 0 : index
    %c0_2 = arith.constant 0 : index
    %c0_3 = arith.constant 0 : index
    %1 = vector.load %arg2[%c0_1, %c0_2, %c0_3] : memref<6x128x128xbf16, #tpu.memory_space<vmem>>, vector<1x128x128xbf16>
    %2 = vector.shape_cast %1 : vector<1x128x128xbf16> to vector<128x128xbf16>
    %cst = arith.constant dense<0.000000e+00> : vector<16x128xf32>
    %3 = tpu.matmul %0, %2, %cst {dimension_numbers = #tpu.dot_dimension_numbers<[1], [0], [0], [1], [0, 0, 1, 1], [], []>} : vector<16x128xbf16>, vector<128x128xbf16>, vector<16x128xf32> -> vector<16x128xf32>
    %c0_4 = arith.constant 0 : index
    %c0_5 = arith.constant 0 : index
    %4 = vector.load %arg3[%c0_4, %c0_5] : memref<8x128xf32, #tpu.memory_space<vmem>>, vector<1x128xf32>
    %5 = vector.broadcast %4 : vector<1x128xf32> to vector<16x128xf32>
    %6 = arith.addf %3, %5 : vector<16x128xf32>
    %cst_6 = arith.constant 0.000000e+00 : f32
    %7 = vector.broadcast %cst_6 : f32 to vector<16x128xf32>
    %8 = arith.maximumf %6, %7 : vector<16x128xf32>
    %9 = arith.truncf %8 : vector<16x128xf32> to vector<16x128xbf16>
    %c1 = arith.constant 1 : index
    %c0_7 = arith.constant 0 : index
    %c0_8 = arith.constant 0 : index
    %10 = vector.load %arg2[%c1, %c0_7, %c0_8] : memref<6x128x128xbf16, #tpu.memory_space<vmem>>, vector<1x128x128xbf16>
    %11 = vector.shape_cast %10 : vector<1x128x128xbf16> to vector<128x128xbf16>
    %cst_9 = arith.constant dense<0.000000e+00> : vector<16x128xf32>
    %12 = tpu.matmul %9, %11, %cst_9 {dimension_numbers = #tpu.dot_dimension_numbers<[1], [0], [0], [1], [0, 0, 1, 1], [], []>} : vector<16x128xbf16>, vector<128x128xbf16>, vector<16x128xf32> -> vector<16x128xf32>
    %c1_10 = arith.constant 1 : index
    %c0_11 = arith.constant 0 : index
    %13 = vector.load %arg3[%c1_10, %c0_11] : memref<8x128xf32, #tpu.memory_space<vmem>>, vector<1x128xf32>
    %14 = vector.broadcast %13 : vector<1x128xf32> to vector<16x128xf32>
    %15 = arith.addf %12, %14 : vector<16x128xf32>
    %cst_12 = arith.constant 0.000000e+00 : f32
    %16 = vector.broadcast %cst_12 : f32 to vector<16x128xf32>
    %17 = arith.maximumf %15, %16 : vector<16x128xf32>
    %18 = arith.truncf %17 : vector<16x128xf32> to vector<16x128xbf16>
    %c2 = arith.constant 2 : index
    %c0_13 = arith.constant 0 : index
    %c0_14 = arith.constant 0 : index
    %19 = vector.load %arg2[%c2, %c0_13, %c0_14] : memref<6x128x128xbf16, #tpu.memory_space<vmem>>, vector<1x128x128xbf16>
    %20 = vector.shape_cast %19 : vector<1x128x128xbf16> to vector<128x128xbf16>
    %cst_15 = arith.constant dense<0.000000e+00> : vector<16x128xf32>
    %21 = tpu.matmul %18, %20, %cst_15 {dimension_numbers = #tpu.dot_dimension_numbers<[1], [0], [0], [1], [0, 0, 1, 1], [], []>} : vector<16x128xbf16>, vector<128x128xbf16>, vector<16x128xf32> -> vector<16x128xf32>
    %c2_16 = arith.constant 2 : index
    %c0_17 = arith.constant 0 : index
    %22 = vector.load %arg3[%c2_16, %c0_17] : memref<8x128xf32, #tpu.memory_space<vmem>>, vector<1x128xf32>
    %23 = vector.broadcast %22 : vector<1x128xf32> to vector<16x128xf32>
    %24 = arith.addf %21, %23 : vector<16x128xf32>
    %cst_18 = arith.constant 0.000000e+00 : f32
    %25 = vector.broadcast %cst_18 : f32 to vector<16x128xf32>
    %26 = arith.maximumf %24, %25 : vector<16x128xf32>
    %27 = arith.truncf %26 : vector<16x128xf32> to vector<16x128xbf16>
    %c3 = arith.constant 3 : index
    %c0_19 = arith.constant 0 : index
    %c0_20 = arith.constant 0 : index
    %28 = vector.load %arg2[%c3, %c0_19, %c0_20] : memref<6x128x128xbf16, #tpu.memory_space<vmem>>, vector<1x128x128xbf16>
    %29 = vector.shape_cast %28 : vector<1x128x128xbf16> to vector<128x128xbf16>
    %cst_21 = arith.constant dense<0.000000e+00> : vector<16x128xf32>
    %30 = tpu.matmul %27, %29, %cst_21 {dimension_numbers = #tpu.dot_dimension_numbers<[1], [0], [0], [1], [0, 0, 1, 1], [], []>} : vector<16x128xbf16>, vector<128x128xbf16>, vector<16x128xf32> -> vector<16x128xf32>
    %c3_22 = arith.constant 3 : index
    %c0_23 = arith.constant 0 : index
    %31 = vector.load %arg3[%c3_22, %c0_23] : memref<8x128xf32, #tpu.memory_space<vmem>>, vector<1x128xf32>
    %32 = vector.broadcast %31 : vector<1x128xf32> to vector<16x128xf32>
    %33 = arith.addf %30, %32 : vector<16x128xf32>
    %cst_24 = arith.constant 0.000000e+00 : f32
    %34 = vector.broadcast %cst_24 : f32 to vector<16x128xf32>
    %35 = arith.maximumf %33, %34 : vector<16x128xf32>
    %36 = arith.truncf %35 : vector<16x128xf32> to vector<16x128xbf16>
    %c4 = arith.constant 4 : index
    %c0_25 = arith.constant 0 : index
    %c0_26 = arith.constant 0 : index
    %37 = vector.load %arg2[%c4, %c0_25, %c0_26] : memref<6x128x128xbf16, #tpu.memory_space<vmem>>, vector<1x128x128xbf16>
    %38 = vector.shape_cast %37 : vector<1x128x128xbf16> to vector<128x128xbf16>
    %cst_27 = arith.constant dense<0.000000e+00> : vector<16x128xf32>
    %39 = tpu.matmul %36, %38, %cst_27 {dimension_numbers = #tpu.dot_dimension_numbers<[1], [0], [0], [1], [0, 0, 1, 1], [], []>} : vector<16x128xbf16>, vector<128x128xbf16>, vector<16x128xf32> -> vector<16x128xf32>
    %c4_28 = arith.constant 4 : index
    %c0_29 = arith.constant 0 : index
    %40 = vector.load %arg3[%c4_28, %c0_29] : memref<8x128xf32, #tpu.memory_space<vmem>>, vector<1x128xf32>
    %41 = vector.broadcast %40 : vector<1x128xf32> to vector<16x128xf32>
    %42 = arith.addf %39, %41 : vector<16x128xf32>
    %cst_30 = arith.constant 0.000000e+00 : f32
    %43 = vector.broadcast %cst_30 : f32 to vector<16x128xf32>
    %44 = arith.maximumf %42, %43 : vector<16x128xf32>
    %45 = arith.truncf %44 : vector<16x128xf32> to vector<16x128xbf16>
    %c5 = arith.constant 5 : index
    %c0_31 = arith.constant 0 : index
    %c0_32 = arith.constant 0 : index
    %46 = vector.load %arg2[%c5, %c0_31, %c0_32] : memref<6x128x128xbf16, #tpu.memory_space<vmem>>, vector<1x128x128xbf16>
    %47 = vector.shape_cast %46 : vector<1x128x128xbf16> to vector<128x128xbf16>
    %cst_33 = arith.constant dense<0.000000e+00> : vector<16x128xf32>
    %48 = tpu.matmul %45, %47, %cst_33 {dimension_numbers = #tpu.dot_dimension_numbers<[1], [0], [0], [1], [0, 0, 1, 1], [], []>} : vector<16x128xbf16>, vector<128x128xbf16>, vector<16x128xf32> -> vector<16x128xf32>
    %c5_34 = arith.constant 5 : index
    %c0_35 = arith.constant 0 : index
    %49 = vector.load %arg3[%c5_34, %c0_35] : memref<8x128xf32, #tpu.memory_space<vmem>>, vector<1x128xf32>
    %50 = vector.broadcast %49 : vector<1x128xf32> to vector<16x128xf32>
    %51 = arith.addf %48, %50 : vector<16x128xf32>
    %52 = arith.truncf %51 : vector<16x128xf32> to vector<16x128xbf16>
    %c0_36 = arith.constant 0 : index
    %c0_37 = arith.constant 0 : index
    %53 = vector.load %arg4[%c0_36, %c0_37] : memref<16x128xbf16, #tpu.memory_space<vmem>>, vector<16x128xbf16>
    tpu.vector_store %arg4[%c0_36, %c0_37], %52 {strides = array<i32>} : memref<16x128xbf16, #tpu.memory_space<vmem>>, vector<16x128xbf16>,
    return
  }
  func.func @transform_0(%arg0: i32) -> (i32, i32) {
    %c0_i32 = arith.constant 0 : i32
    %c0_i32_0 = arith.constant 0 : i32
    return %arg0, %c0_i32 : i32, i32
  }
  func.func @transform_1(%arg0: i32) -> (i32, i32, i32) {
    %c0_i32 = arith.constant 0 : i32
    %c0_i32_0 = arith.constant 0 : i32
    %c0_i32_1 = arith.constant 0 : i32
    %c0_i32_2 = arith.constant 0 : i32
    return %c0_i32, %c0_i32_0, %c0_i32_1 : i32, i32, i32
  }
  func.func @transform_2(%arg0: i32) -> (i32, i32) {
    %c0_i32 = arith.constant 0 : i32
    %c0_i32_0 = arith.constant 0 : i32
    %c0_i32_1 = arith.constant 0 : i32
    return %c0_i32, %c0_i32_0 : i32, i32
  }
  func.func @transform_3(%arg0: i32) -> (i32, i32) {
    %c0_i32 = arith.constant 0 : i32
    %c0_i32_0 = arith.constant 0 : i32
    return %arg0, %c0_i32 : i32, i32
  }
}

</mosaic_0001>

<bundles_post_ra>
// kernel: tpu_custom_call.1
= control target key start
LH: loop header
LB: loop body
LE: loop exit
PB: predicated region body
PF: predicated region fallthrough
CT: control target
= control target key end

     0   :  { %8 = vsyncpa [#allocation3], 0  ;;  %s1312_s0 = inlined_call_operand.hbm [shape: bf16[16,128], index: 0, kind: input, shape index: {}]   ;;  %s1313_s1 = inlined_call_operand.hbm [shape: bf16[6,128,128], index: 1, kind: input, shape index: {}]   ;;  %s1314_s2 = inlined_call_operand.hbm [shape: f32[8,128], index: 2, kind: input, shape index: {}]   ;;  %s1315_s3 = inlined_call_operand.hbm [shape: bf16[16,128], index: 3, kind: output, shape index: {}]  }
   0x1   :  { %9 = vsyncpa [#allocation6], 0 }
   0x2   :  { %10 = vsyncpa [#allocation4], 0  ;;  %s1160_s12 = smov [#allocation5]   ;;  %s1161_s14 = smov [#allocation2]  }
   0x3   :  { %s28_s13 = sshll.u32 %s1160_s12, 4  ;;  %s16_s15 = sshll.u32 %s1161_s14, 4  ;;  %s29_s13 = int_to_ptr.vmem [resolvable:$true] %s28_s13  ;;  %s1188_s15 = int_to_ptr.vmem [resolvable:$true] %s16_s15 }
   0x4   :  { %s1066_s18 = scalar_lea.hbm %s1313_s1, 6144 }
   0x5   :  { %p1067_p0 = scmp.ne.s32.totalorder %s1313_s1, %s1066_s18  ;;  %p1070_p1 = scmp.lt.u32.totalorder %s1066_s18, %s1313_s1 }
   0x7   :  { %p1072_p2 = pnand %p1070_p1, %p1067_p0 }
   0x9   :  { %1075 = shalt.err (!%p1072_p2)
}
   0xa   :  { %s1076_s23 = scalar_lea.vmem %s29_s13, 6144  ;;  %p1081_p4 = scmp.lt.s32.totalorder %s29_s13, %s29_s13 }
   0xb   :  { %p1077_p3 = scmp.ne.s32.totalorder %s29_s13, %s1076_s23  ;;  %p1082_p5 = scmp.lt.s32.totalorder %s1076_s23, %s1076_s23 }
   0xd   :  { %p1083_p6 = por %p1082_p5, %p1081_p4 }
   0xf   :  { %p1084_p7 = pnand %p1083_p6, %p1077_p3 }
  0x11   :  { %1087 = shalt.err (!%p1084_p7)
}
  0x12   :  { %s1162_s24 = smov 64   ;;  %s1163_s25 = smov 4  }
  0x13   :  { %34 = dma.hbm_to_vmem [thread:$0]  %s1313_s1, 6144, %s29_s13, [#allocation6], %s1162_s24, %s1162_s24, %s1163_s25  }
  0x14   :  { %s1088_s30 = scalar_lea.hbm %s1312_s0, 128 }
  0x15   :  { %p1089_p8 = scmp.ne.s32.totalorder %s1312_s0, %s1088_s30  ;;  %p1092_p9 = scmp.lt.u32.totalorder %s1088_s30, %s1312_s0 }
  0x17   :  { %p1094_p10 = pnand %p1092_p9, %p1089_p8 }
  0x19   :  { %1097 = shalt.err (!%p1094_p10)
}
  0x1a   :  { %s1098_s8 = scalar_lea.vmem %s1188_s15, 128  ;;  %p1103_p12 = scmp.lt.s32.totalorder %s1188_s15, %s1188_s15 }
  0x1b   :  { %p1099_p11 = scmp.ne.s32.totalorder %s1188_s15, %s1098_s8  ;;  %p1104_p13 = scmp.lt.s32.totalorder %s1098_s8, %s1098_s8 }
  0x1d   :  { %p1105_p0 = por %p1104_p13, %p1103_p12 }
  0x1f   :  { %p1106_p1 = pnand %p1105_p0, %p1099_p11 }
  0x21   :  { %1109 = shalt.err (!%p1106_p1)
}
  0x22   :  { %22 = dma.hbm_to_vmem [thread:$0]  %s1312_s0, 128, %s1188_s15, [#allocation3], %s1162_s24, %s1162_s24, %s1163_s25  }
  0x23   :  { %s1164_s10 = smov [#allocation7]   ;;  %s1110_s14 = scalar_lea.hbm %s1314_s2, 128 }
  0x24   :  { %s41_s11 = sshll.u32 %s1164_s10, 4  ;;  %p1111_p2 = scmp.ne.s32.totalorder %s1314_s2, %s1110_s14  ;;  %s42_s11 = int_to_ptr.vmem [resolvable:$true] %s41_s11 }
  0x25   :  { %p1114_p3 = scmp.lt.u32.totalorder %s1110_s14, %s1314_s2 }
  0x27   :  { %p1116_p4 = pnand %p1114_p3, %p1111_p2 }
  0x29   :  { %1119 = shalt.err (!%p1116_p4)
}
  0x2a   :  { %s1120_s20 = scalar_lea.vmem %s42_s11, 128  ;;  %p1125_p6 = scmp.lt.s32.totalorder %s42_s11, %s42_s11 }
  0x2b   :  { %p1121_p5 = scmp.ne.s32.totalorder %s42_s11, %s1120_s20  ;;  %p1126_p7 = scmp.lt.s32.totalorder %s1120_s20, %s1120_s20 }
  0x2d   :  { %p1127_p8 = por %p1126_p7, %p1125_p6 }
  0x2f   :  { %p1128_p9 = pnand %p1127_p8, %p1121_p5 }
  0x31   :  { %1131 = shalt.err (!%p1128_p9)
}
  0x32   :  { %44 = dma.hbm_to_vmem [thread:$0]  %s1314_s2, 128, %s42_s11, [#allocation6]  }
  0x33   :  { %1154 = dma.done.wait [#allocation3], 128  }
  0x34   :  { %1155 = vsyncadd [#allocation3], 4294967168 }
  0x35   :  { %1156 = dma.done.wait [#allocation6], 6272  }
  0x36   :  { %1157 = vsyncadd [#allocation6], 4294961024  ;;  %v1165_v0 = vmov 0.0   ;;  %vm1166_vm0 = vmmov 0   ;;  %v1017_v1 = vld [vmem:[#allocation5] sm:$0xff]   ;;  %v1018_v2 = vld [vmem:[#allocation5 + $0x8] sm:$0xff]  }
  0x37   :  { %889 = vmatprep.subr.bf16.mxu0 %v1165_v0  ;;  %905 = vmatprep.mubr.msk.bf16.mxu0 %vm1166_vm0, %v1165_v0  ;;  %v1019_v3 = vld [vmem:[#allocation5 + $0x10] sm:$0xff]   ;;  %v1026_v4 = vld [vmem:[#allocation5 + $0x40] sm:$0xff]   ;;  %v1020_v5 = vld [vmem:[#allocation5 + $0x18] sm:$0xff]   ;;  %s1167_s2 = smov [#allocation8]  }
  0x38   :  { %909 = vmatprep.subr.bf16.mxu1 %v1165_v0  ;;  %925 = vmatprep.mubr.msk.bf16.mxu1 %vm1166_vm0, %v1165_v0  ;;  %v1027_v6 = vld [vmem:[#allocation5 + $0x48] sm:$0xff]   ;;  %v1021_v7 = vld [vmem:[#allocation5 + $0x20] sm:$0xff]   ;;  %v1028_v8 = vld [vmem:[#allocation5 + $0x50] sm:$0xff]   ;;  %s758_s21 = sshll.u32 %s1167_s2, 4  ;;  %s759_s21 = int_to_ptr.vmem [resolvable:$true] %s758_s21 }
  0x39   :  { %890 = vmatpush3.bf16.msra.mxu0 %v1017_v1  ;;  %910 = vmatpush3.bf16.msra.mxu1 %v1026_v4  ;;  %v1022_v9 = vld [vmem:[#allocation5 + $0x28] sm:$0xff]   ;;  %v1029_v10 = vld [vmem:[#allocation5 + $0x58] sm:$0xff]   ;;  %v1023_v11 = vld [vmem:[#allocation5 + $0x30] sm:$0xff]   ;;  %s1132_s22 = scalar_lea.vmem %s759_s21, 128  ;;  %p1137_p11 = scmp.lt.s32.totalorder %s759_s21, %s759_s21 }
  0x3a   :  { %891 = vmatprep.subr.bf16.mxu0 %v1165_v0  ;;  %911 = vmatprep.subr.bf16.mxu1 %v1165_v0  ;;  %v1030_v12 = vld [vmem:[#allocation5 + $0x60] sm:$0xff]   ;;  %v1024_v13 = vld [vmem:[#allocation5 + $0x38] sm:$0xff]   ;;  %v1031_v14 = vld [vmem:[#allocation5 + $0x68] sm:$0xff]   ;;  %p1133_p10 = scmp.ne.s32.totalorder %s759_s21, %s1132_s22  ;;  %p1138_p12 = scmp.lt.s32.totalorder %s1132_s22, %s1132_s22 }
  0x3b   :  { %v1025_v15 = vld [vmem:[#allocation2] sm:$0xff]   ;;  %v1032_v16 = vld [vmem:[#allocation5 + $0x70] sm:$0xff]   ;;  %v1034_v18 = vld [vmem:[#allocation5 + $0x80] sm:$0xff]  }
  0x3c   :  { %v1033_v17 = vld [vmem:[#allocation5 + $0x78] sm:$0xff]   ;;  %v1035_v19 = vld [vmem:[#allocation5 + $0x88] sm:$0xff]   ;;  %v1036_v20 = vld [vmem:[#allocation5 + $0x90] sm:$0xff]   ;;  %p1139_p13 = por %p1138_p12, %p1137_p11 }
  0x3d   :  { %892 = vmatpush3.bf16.msra.mxu0 %v1018_v2  ;;  %912 = vmatpush3.bf16.msra.mxu1 %v1027_v6  ;;  %v1037_v21 = vld [vmem:[#allocation5 + $0x98] sm:$0xff]   ;;  %v1038_v22 = vld [vmem:[#allocation5 + $0xa0] sm:$0xff]   ;;  %v1039_v23 = vld [vmem:[#allocation5 + $0xa8] sm:$0xff]  }
  0x3e   :  { %893 = vmatprep.subr.bf16.mxu0 %v1165_v0  ;;  %913 = vmatprep.subr.bf16.mxu1 %v1165_v0  ;;  %v771_v24 = vld [vmem:[#allocation7] ss:$0 sm:$0xff]  ;;  %v1040_v34 = vld [vmem:[#allocation5 + $0xb0] sm:$0xff]   ;;  %v1041_v35 = vld [vmem:[#allocation5 + $0xb8] sm:$0xff]   ;;  %p1140_p0 = pnand %p1139_p13, %p1133_p10 }
  0x3f   :  { %v1042_v36 = vld [vmem:[#allocation5 + $0xc0] sm:$0xff]   ;;  %v1043_v37 = vld [vmem:[#allocation5 + $0xc8] sm:$0xff]   ;;  %v1044_v38 = vld [vmem:[#allocation5 + $0xd0] sm:$0xff]  }
  0x40   :  { %v1045_v39 = vld [vmem:[#allocation5 + $0xd8] sm:$0xff]   ;;  %v1046_v40 = vld [vmem:[#allocation5 + $0xe0] sm:$0xff]   ;;  %v1047_v41 = vld [vmem:[#allocation5 + $0xe8] sm:$0xff]  }
  0x41   :  { %894 = vmatpush3.bf16.msra.mxu0 %v1019_v3  ;;  %914 = vmatpush3.bf16.msra.mxu1 %v1028_v8  ;;  %v781_v42 = vld [vmem:[#allocation7 + $0x1] ss:$0 sm:$0xff]  ;;  %v1048_v52 = vld [vmem:[#allocation5 + $0xf0] sm:$0xff]   ;;  %v1049_v53 = vld [vmem:[#allocation5 + $0xf8] sm:$0xff]  }
  0x42   :  { %895 = vmatprep.subr.bf16.mxu0 %v1165_v0  ;;  %915 = vmatprep.subr.bf16.mxu1 %v1165_v0  ;;  %v1050_v54 = vld [vmem:[#allocation5 + $0x100] sm:$0xff]   ;;  %v1051_v55 = vld [vmem:[#allocation5 + $0x108] sm:$0xff]   ;;  %v1052_v56 = vld [vmem:[#allocation5 + $0x110] sm:$0xff]  }
  0x43   :  { %v1053_v57 = vld [vmem:[#allocation5 + $0x118] sm:$0xff]   ;;  %v1054_v58 = vld [vmem:[#allocation5 + $0x120] sm:$0xff]   ;;  %v1055_v59 = vld [vmem:[#allocation5 + $0x128] sm:$0xff]  }
  0x44   :  { %v790_v60 = vld [vmem:[#allocation7 + $0x2] ss:$0 sm:$0xff]  ;;  %v1057_v8 = vld [vmem:[#allocation5 + $0x138] sm:$0xff]  }
  0x45   :  { %896 = vmatpush3.bf16.msra.mxu0 %v1020_v5  ;;  %916 = vmatpush3.bf16.msra.mxu1 %v1029_v10  ;;  %v1059_v10 = vld [vmem:[#allocation5 + $0x148] sm:$0xff]  }
  0x46   :  { %897 = vmatprep.subr.bf16.mxu0 %v1165_v0  ;;  %917 = vmatprep.subr.bf16.mxu1 %v1165_v0 }
  0x49   :  { %898 = vmatpush3.bf16.msra.mxu0 %v1021_v7  ;;  %918 = vmatpush3.bf16.msra.mxu1 %v1030_v12  ;;  %v1056_v7 = vld [vmem:[#allocation5 + $0x130] sm:$0xff]   ;;  %v1061_v12 = vld [vmem:[#allocation5 + $0x158] sm:$0xff]  }
  0x4a   :  { %899 = vmatprep.subr.bf16.mxu0 %v1165_v0  ;;  %919 = vmatprep.subr.bf16.mxu1 %v1165_v0 }
  0x4d   :  { %900 = vmatpush3.bf16.msra.mxu0 %v1022_v9  ;;  %920 = vmatpush3.bf16.msra.mxu1 %v1031_v14  ;;  %v1058_v9 = vld [vmem:[#allocation5 + $0x140] sm:$0xff]   ;;  %v1063_v14 = vld [vmem:[#allocation5 + $0x168] sm:$0xff]  }
  0x4e   :  { %901 = vmatprep.subr.bf16.mxu0 %v1165_v0  ;;  %921 = vmatprep.subr.bf16.mxu1 %v1165_v0 }
  0x51   :  { %902 = vmatpush3.bf16.msra.mxu0 %v1023_v11  ;;  %922 = vmatpush3.bf16.msra.mxu1 %v1032_v16  ;;  %v1060_v11 = vld [vmem:[#allocation5 + $0x150] sm:$0xff]  }
  0x52   :  { %903 = vmatprep.subr.bf16.mxu0 %v1165_v0  ;;  %923 = vmatprep.subr.bf16.mxu1 %v1165_v0 }
  0x55   :  { %904 = vmatpush3.bf16.msra.mxu0 %v1024_v13  ;;  %924 = vmatpush3.bf16.msra.mxu1 %v1033_v17  ;;  %v1062_v13 = vld [vmem:[#allocation5 + $0x160] sm:$0xff]  }
  0x56   :  { %929 = vmatprep.subr.bf16.mxu0 %v1165_v0  ;;  %949 = vmatprep.subr.bf16.mxu1 %v1165_v0 }
  0x58   :  { %906 = vmatmul.mubr.bf16.vlgmr.msra.gmra.mrb[0].mxu0 %v1025_v15  ;;  %v799_v15 = vld [vmem:[#allocation7 + $0x3] ss:$0 sm:$0xff] }
  0x59   :  { %945 = vmatprep.mubr.msk.bf16.mxu0 %vm1166_vm0, %v1165_v0  ;;  %930 = vmatpush3.bf16.msra.mxu0 %v1034_v18 }
  0x5a   :  { %931 = vmatprep.subr.bf16.mxu0 %v1165_v0 }
  0x5d   :  { %932 = vmatpush3.bf16.msra.mxu0 %v1035_v19 }
  0x5e   :  { %933 = vmatprep.subr.bf16.mxu0 %v1165_v0 }
  0x61   :  { %934 = vmatpush3.bf16.msra.mxu0 %v1036_v20 }
  0x62   :  { %935 = vmatprep.subr.bf16.mxu0 %v1165_v0 }
  0x65   :  { %936 = vmatpush3.bf16.msra.mxu0 %v1037_v21 }
  0x66   :  { %937 = vmatprep.subr.bf16.mxu0 %v1165_v0 }
  0x69   :  { %938 = vmatpush3.bf16.msra.mxu0 %v1038_v22 }
  0x6a   :  { %939 = vmatprep.subr.bf16.mxu0 %v1165_v0 }
  0x6d   :  { %940 = vmatpush3.bf16.msra.mxu0 %v1039_v23 }
  0x6e   :  { %941 = vmatprep.subr.bf16.mxu0 %v1165_v0 }
  0x71   :  { %942 = vmatpush3.bf16.msra.mxu0 %v1040_v34 }
  0x72   :  { %943 = vmatprep.subr.bf16.mxu0 %v1165_v0 }
  0x75   :  { %944 = vmatpush3.bf16.msra.mxu0 %v1041_v35 }
  0x76   :  { %969 = vmatprep.subr.bf16.mxu0 %v1165_v0 }
 0x12b   :  { %v166_v25 = vpop.f32.mrb[0].mxu0 }
 0x12c   :  { %v167_v26 = vadd.f32 %v771_v24, %v166_v25  ;;  %v907_v27 = vpop.f32.mrb[1].mxu0  ;;  %v1064_v25 = vld [vmem:[#allocation5 + $0x170] sm:$0xff]  }
 0x12d   :  { %v169_v28 = vpop.f32.mrb[2].mxu0  ;;  %v808_v27 = vld [vmem:[#allocation7 + $0x4] ss:$0 sm:$0xff] }
 0x12e   :  { %v170_v29 = vadd.f32 %v771_v24, %v169_v28  ;;  %v908_v30 = vpop.f32.mrb[3].mxu0  ;;  %v173_v31 = vmax.f32 %v167_v26, 0.0  ;;  %v1065_v26 = vld [vmem:[#allocation5 + $0x178] sm:$0xff]  }
 0x130   :  { %v174_v32 = vmax.f32 %v170_v29, 0.0 }
 0x132   :  { %v175_v33 = vpack.c.bf16 %v174_v32, %v173_v31 }
 0x134   :  { %926 = vmatmul.mubr.bf16.vlgmr.msra.gmra.mrb[0].mxu1 %v175_v33 }
 0x135   :  { %965 = vmatprep.mubr.msk.bf16.mxu1 %vm1166_vm0, %v1165_v0  ;;  %950 = vmatpush3.bf16.msra.mxu1 %v1042_v36 }
 0x136   :  { %951 = vmatprep.subr.bf16.mxu1 %v1165_v0 }
 0x139   :  { %952 = vmatpush3.bf16.msra.mxu1 %v1043_v37  ;;  %v817_v37 = vld [vmem:[#allocation7 + $0x5] ss:$0 sm:$0xff] }
 0x13a   :  { %953 = vmatprep.subr.bf16.mxu1 %v1165_v0 }
 0x13d   :  { %954 = vmatpush3.bf16.msra.mxu1 %v1044_v38 }
 0x13e   :  { %955 = vmatprep.subr.bf16.mxu1 %v1165_v0 }
 0x141   :  { %956 = vmatpush3.bf16.msra.mxu1 %v1045_v39 }
 0x142   :  { %957 = vmatprep.subr.bf16.mxu1 %v1165_v0 }
 0x145   :  { %958 = vmatpush3.bf16.msra.mxu1 %v1046_v40 }
 0x146   :  { %959 = vmatprep.subr.bf16.mxu1 %v1165_v0 }
 0x149   :  { %960 = vmatpush3.bf16.msra.mxu1 %v1047_v41 }
 0x14a   :  { %961 = vmatprep.subr.bf16.mxu1 %v1165_v0 }
 0x14d   :  { %962 = vmatpush3.bf16.msra.mxu1 %v1048_v52 }
 0x14e   :  { %963 = vmatprep.subr.bf16.mxu1 %v1165_v0 }
 0x151   :  { %964 = vmatpush3.bf16.msra.mxu1 %v1049_v53 }
 0x152   :  { %989 = vmatprep.subr.bf16.mxu1 %v1165_v0 }
 0x207   :  { %v280_v43 = vpop.f32.mrb[0].mxu1 }
 0x208   :  { %v281_v44 = vadd.f32 %v781_v42, %v280_v43  ;;  %v927_v45 = vpop.f32.mrb[1].mxu1 }
 0x209   :  { %v283_v46 = vpop.f32.mrb[2].mxu1 }
 0x20a   :  { %v284_v47 = vadd.f32 %v781_v42, %v283_v46  ;;  %v928_v48 = vpop.f32.mrb[3].mxu1  ;;  %v287_v49 = vmax.f32 %v281_v44, 0.0 }
 0x20c   :  { %v288_v50 = vmax.f32 %v284_v47, 0.0 }
 0x20e   :  { %v289_v51 = vpack.c.bf16 %v288_v50, %v287_v49 }
 0x210   :  { %946 = vmatmul.mubr.bf16.vlgmr.msra.gmra.mrb[4].mxu0 %v289_v51 }
 0x211   :  { %985 = vmatprep.mubr.msk.bf16.mxu0 %vm1166_vm0, %v1165_v0  ;;  %970 = vmatpush3.bf16.msra.mxu0 %v1050_v54 }
 0x212   :  { %971 = vmatprep.subr.bf16.mxu0 %v1165_v0 }
 0x215   :  { %972 = vmatpush3.bf16.msra.mxu0 %v1051_v55 }
 0x216   :  { %973 = vmatprep.subr.bf16.mxu0 %v1165_v0 }
 0x219   :  { %974 = vmatpush3.bf16.msra.mxu0 %v1052_v56 }
 0x21a   :  { %975 = vmatprep.subr.bf16.mxu0 %v1165_v0 }
 0x21d   :  { %976 = vmatpush3.bf16.msra.mxu0 %v1053_v57 }
 0x21e   :  { %977 = vmatprep.subr.bf16.mxu0 %v1165_v0 }
 0x221   :  { %978 = vmatpush3.bf16.msra.mxu0 %v1054_v58 }
 0x222   :  { %979 = vmatprep.subr.bf16.mxu0 %v1165_v0 }
 0x225   :  { %980 = vmatpush3.bf16.msra.mxu0 %v1055_v59 }
 0x226   :  { %981 = vmatprep.subr.bf16.mxu0 %v1165_v0 }
 0x229   :  { %982 = vmatpush3.bf16.msra.mxu0 %v1056_v7 }
 0x22a   :  { %983 = vmatprep.subr.bf16.mxu0 %v1165_v0 }
 0x22d   :  { %984 = vmatpush3.bf16.msra.mxu0 %v1057_v8 }
 0x2e3   :  { %v394_v61 = vpop.f32.mrb[4].mxu0 }
 0x2e4   :  { %v395_v62 = vadd.f32 %v790_v60, %v394_v61  ;;  %v947_v63 = vpop.f32.mrb[5].mxu0 }
 0x2e5   :  { %v397_v1 = vpop.f32.mrb[6].mxu0 }
 0x2e6   :  { %v398_v2 = vadd.f32 %v790_v60, %v397_v1  ;;  %v948_v3 = vpop.f32.mrb[7].mxu0  ;;  %v401_v4 = vmax.f32 %v395_v62, 0.0 }
 0x2e8   :  { %v402_v5 = vmax.f32 %v398_v2, 0.0 }
 0x2ea   :  { %v403_v6 = vpack.c.bf16 %v402_v5, %v401_v4 }
 0x2ec   :  { %966 = vmatmul.mubr.bf16.vlgmr.msra.gmra.mrb[4].mxu1 %v403_v6 }
 0x2ed   :  { %1005 = vmatprep.mubr.msk.bf16.mxu1 %vm1166_vm0, %v1165_v0  ;;  %990 = vmatpush3.bf16.msra.mxu1 %v1058_v9 }
 0x2ee   :  { %991 = vmatprep.subr.bf16.mxu1 %v1165_v0 }
 0x2f1   :  { %992 = vmatpush3.bf16.msra.mxu1 %v1059_v10 }
 0x2f2   :  { %993 = vmatprep.subr.bf16.mxu1 %v1165_v0 }
 0x2f5   :  { %994 = vmatpush3.bf16.msra.mxu1 %v1060_v11 }
 0x2f6   :  { %995 = vmatprep.subr.bf16.mxu1 %v1165_v0 }
 0x2f9   :  { %996 = vmatpush3.bf16.msra.mxu1 %v1061_v12 }
 0x2fa   :  { %997 = vmatprep.subr.bf16.mxu1 %v1165_v0 }
 0x2fd   :  { %998 = vmatpush3.bf16.msra.mxu1 %v1062_v13 }
 0x2fe   :  { %999 = vmatprep.subr.bf16.mxu1 %v1165_v0 }
 0x301   :  { %1000 = vmatpush3.bf16.msra.mxu1 %v1063_v14 }
 0x302   :  { %1001 = vmatprep.subr.bf16.mxu1 %v1165_v0 }
 0x305   :  { %1002 = vmatpush3.bf16.msra.mxu1 %v1064_v25 }
 0x306   :  { %1003 = vmatprep.subr.bf16.mxu1 %v1165_v0 }
 0x309   :  { %1004 = vmatpush3.bf16.msra.mxu1 %v1065_v26 }
 0x3bf   :  { %v508_v16 = vpop.f32.mrb[4].mxu1 }
 0x3c0   :  { %v509_v17 = vadd.f32 %v799_v15, %v508_v16  ;;  %v967_v18 = vpop.f32.mrb[5].mxu1 }
 0x3c1   :  { %v511_v19 = vpop.f32.mrb[6].mxu1 }
 0x3c2   :  { %v512_v20 = vadd.f32 %v799_v15, %v511_v19  ;;  %v968_v21 = vpop.f32.mrb[7].mxu1  ;;  %v515_v22 = vmax.f32 %v509_v17, 0.0 }
 0x3c4   :  { %v516_v23 = vmax.f32 %v512_v20, 0.0 }
 0x3c6   :  { %v517_v24 = vpack.c.bf16 %v516_v23, %v515_v22 }
 0x3c8   :  { %986 = vmatmul.mubr.bf16.vlgmr.msra.gmra.mrb[8].mxu0 %v517_v24 }
 0x49b   :  { %v622_v28 = vpop.f32.mrb[8].mxu0 }
 0x49c   :  { %v623_v29 = vadd.f32 %v808_v27, %v622_v28  ;;  %v987_v30 = vpop.f32.mrb[9].mxu0 }
 0x49d   :  { %v625_v31 = vpop.f32.mrb[10].mxu0 }
 0x49e   :  { %v626_v32 = vadd.f32 %v808_v27, %v625_v31  ;;  %v988_v33 = vpop.f32.mrb[11].mxu0  ;;  %v629_v34 = vmax.f32 %v623_v29, 0.0 }
 0x4a0   :  { %v630_v35 = vmax.f32 %v626_v32, 0.0 }
 0x4a2   :  { %v631_v36 = vpack.c.bf16 %v630_v35, %v629_v34 }
 0x4a4   :  { %1006 = vmatmul.mubr.bf16.vlgmr.msra.gmra.mrb[8].mxu1 %v631_v36 }
 0x577   :  { %v736_v38 = vpop.f32.mrb[8].mxu1 }
 0x578   :  { %v1007_v39 = vpop.f32.mrb[9].mxu1  ;;  %v737_v0 = vadd.f32 %v817_v37, %v736_v38 }
 0x579   :  { %v739_v40 = vpop.f32.mrb[10].mxu1 }
 0x57a   :  { %v740_v41 = vadd.f32 %v817_v37, %v739_v40  ;;  %v1008_v42 = vpop.f32.mrb[11].mxu1 }
 0x57c   :  { %v833_v43 = vpack.c.bf16 %v740_v41, %v737_v0 }
 0x57e   :  { %834 = vst [vmem:[#allocation8] sm:$0xff] %v833_v43  }
 0x57f   :  { %1143 = shalt.err (!%p1140_p0)
}
 0x580   :  { %s1144_s27 = scalar_lea.hbm %s1315_s3, 128 }
 0x581   :  { %p1145_p1 = scmp.ne.s32.totalorder %s1315_s3, %s1144_s27  ;;  %p1148_p2 = scmp.lt.u32.totalorder %s1144_s27, %s1315_s3 }
 0x583   :  { %p1150_p3 = pnand %p1148_p2, %p1145_p1 }
 0x585   :  { %1153 = shalt.err (!%p1150_p3)
}
 0x586   :  { %764 = dma.vmem_to_hbm [thread:$0]  %s759_s21, 128, %s1315_s3, [#allocation4], %s1162_s24, %s1162_s24, %s1163_s25  }
 0x587   :  { %1158 = dma.done.wait [#allocation4], 128  }
 0x588   :  { %1159 = vsyncadd [#allocation4], 4294967168 }
 0x589   :  { %768 = vsyncpa [#allocation3], 1 }
 0x58a   :  { %769 = vsyncpa [#allocation6], 1 }
 0x58b   :  { %770 = vsyncpa [#allocation4], 1 }

</bundles_post_ra>
